<compile_context>
chip_gen: v6e
topology: v6e:2x2x1
jax: 0.10.0
libtpu: 0.0.40
codegen_flags: <defaults>
</compile_context>

<pallas_src>
import functools

import jax
import jax.numpy as jnp
from jax import lax
from jax.experimental import pallas as pl
from jax.experimental.pallas import tpu as pltpu


def _mlp_logsoftmax_kernel(x_ref, w0_ref, b0_ref, w1_ref, b1_ref,
                           wp_ref, bp_ref, out_ref, *, sub_b, num_sub, act_dtype):
    """One batch tile.

    x_ref:   [TILE_B, F]  natural row layout (contiguous HBM DMA).
    out_ref: [O, TILE_B]  class-major, lane-dense -> unmasked full-lane stores.

    Compute runs batch-in-lanes ([units, lanes=batch]) so bias adds, activations
    and the log-softmax reduce (over the 8-class sublane axis) are cheap, and is
    chunked into `num_sub` lane sub-tiles of width `sub_b` so f32 intermediates
    stay small regardless of the DMA tile size.
    """
    # Weights / biases are tiny and VMEM-resident; read them once per tile.
    w0 = w0_ref[...]                     # [H0, F]
    b0 = b0_ref[...]                     # [H0, 1]
    w1 = w1_ref[...]                     # [H1, H0]
    b1 = b1_ref[...]                     # [H1, 1]
    wp = wp_ref[...].astype(act_dtype)   # [O, H1]  (bf16 on the v6e/v7x fast path)
    bp = bp_ref[...]                     # [O, 1]   (+1e-10 already folded in)

    # Statically unrolled sub-tile loop (equivalent to fori_loop(unroll=True));
    # offsets are compile-time 128-multiples -> aligned vector loads / stores.
    for j in range(num_sub):
        off = j * sub_b
        xs = x_ref[pl.ds(off, sub_b), :]                        # [sub_b, F]

        # fc0 + ReLU: contract x's feature axis directly (no transpose in HBM).
        h = lax.dot_general(w0, xs, (((1,), (1,)), ((), ())),
                            preferred_element_type=jnp.float32)  # [H0, sub_b]
        h = jnp.maximum(h + b0, 0.0)

        # fc1 + Tanh (tanh rides the EUP slot; optionally bf16 on v6e/v7x).
        h = jnp.dot(w1, h, preferred_element_type=jnp.float32) + b1
        h = jnp.tanh(h.astype(act_dtype))                        # [H1, sub_b]

        # predict layer (the module's +1e-10 is folded into bp by the wrapper).
        logits = jnp.dot(wp, h, preferred_element_type=jnp.float32) + bp

        # LogSoftmax over the class axis (axis 0 == sublanes -> cheap reduce).
        m = jnp.max(logits, axis=0, keepdims=True)               # [1, sub_b]
        shifted = logits - m
        lse = jnp.log(jnp.sum(jnp.exp(shifted), axis=0, keepdims=True))
        out_ref[:, pl.ds(off, sub_b)] = shifted - lse            # [O, sub_b]


def feet_forward_network(x, params, *, tile_b=16384, sub_b=1024,
                         tanh_in_bf16=False, class_major_output=False):
    """Forward pass of FeetForwardNetwork (bn off, dropout off).

    x: [B, F] float32, natural row-major layout (not transposed, not padded —
       the ragged tail is handled by partial grid blocks).
    params: weights [out, in] (torch layout), biases [out, 1].
    Returns [B, O] (module semantics), or with class_major_output=True the
    lane-dense [O, B] slab straight from the kernel (preferred for fused
    consumers: skips the final HBM transpose round trip).

    tile_b: lane (batch) DMA tile, multiple of 128. Default 16384; sweep
            8192-32768 per chip (v5e may want smaller / a higher vmem limit).
    sub_b:  in-kernel compute sub-tile; caps f32 intermediates independently of
            the DMA tile size.
    tanh_in_bf16: run tanh + the predict matmul inputs in bfloat16 — recommended
            on v6e/v7x where the single EUP can become the binding slot; keep
            False on v5e or when bit-strict f32 outputs are required.
    """
    B, F = x.shape
    H0 = params["w0"].shape[0]
    H1 = params["w1"].shape[0]
    O = params["wp"].shape[0]

    # ---- tile selection -----------------------------------------------------
    def round_up(v, m):
        return ((v + m - 1) // m) * m

    tile_b = max(128, (tile_b // 128) * 128)      # lane tiles: multiples of 128
    tile_b = min(tile_b, round_up(B, 128))        # never bigger than the batch
    if B > 2 * 128:
        # Keep grid length >= 2 so the "parallel" batch axis load-balances
        # v7x's two TensorCores (harmless on v5e/v6e).
        tile_b = min(tile_b, round_up(pl.cdiv(B, 2), 128))
    sub_b = max(128, min((sub_b // 128) * 128, tile_b))
    tile_b = (tile_b // sub_b) * sub_b            # ensure tile_b % sub_b == 0
    num_sub = tile_b // sub_b
    grid = (pl.cdiv(B, tile_b),)                  # ragged tail -> partial block

    # Fold the module's `+ 1e-10` into the predict bias once (constant added to
    # every logit; removes one broadcast add per tile).
    bp = params["bp"] + jnp.float32(1e-10)

    act_dtype = jnp.bfloat16 if tanh_in_bf16 else jnp.float32
    kernel = functools.partial(_mlp_logsoftmax_kernel, sub_b=sub_b,
                               num_sub=num_sub, act_dtype=act_dtype)

    cost = pl.CostEstimate(
        flops=2 * B * (F * H0 + H0 * H1 + H1 * O),
        transcendentals=B * (H1 + O + 1),                    # tanh + exp + log
        bytes_accessed=4 * (B * (F + O)
                            + F * H0 + H0 * H1 + H1 * O + H0 + H1 + O),
    )

    out_cm = pl.pallas_call(
        kernel,
        out_shape=jax.ShapeDtypeStruct((O, B), jnp.float32),
        grid=grid,
        in_specs=[
            # x batch tile in natural [B, F] layout: one contiguous HBM read per
            # tile, auto double-buffered (DMA overlapped with compute).
            pl.BlockSpec((tile_b, F), lambda i: (i, 0)),
            # Weights / biases: full-array blocks with constant index_map ->
            # DMA'd once, VMEM-resident for the whole grid (<10 KiB total).
            pl.BlockSpec((H0, F), lambda i: (0, 0)),
            pl.BlockSpec((H0, 1), lambda i: (0, 0)),
            pl.BlockSpec((H1, H0), lambda i: (0, 0)),
            pl.BlockSpec((H1, 1), lambda i: (0, 0)),
            pl.BlockSpec((O, H1), lambda i: (0, 0)),
            pl.BlockSpec((O, 1), lambda i: (0, 0)),
        ],
        # Class-major output: last dim = tile_b (multiple of 128) -> unmasked
        # full-lane stores and a lane-dense HBM slab.
        out_specs=pl.BlockSpec((O, tile_b), lambda i: (0, i)),
        compiler_params=pltpu.CompilerParams(
            dimension_semantics=("parallel",),
            vmem_limit_bytes=32 * 1024 * 1024,
        ),
        cost_estimate=cost,
    )(x, params["w0"], params["b0"], params["w1"], params["b1"],
      params["wp"], bp)

    if class_major_output:
        return out_cm          # [O, B] lane-dense, no extra HBM pass
    # Module-facing layout: one extra HBM round trip of the small [O, B] slab.
    # Consumers that can take class-major logits should set
    # class_major_output=True instead.
    return out_cm.T            # [B, O]


def init_params(key, feature_size, hidden_units, output_size):
    """Deterministic synthetic init (uniform, torch.nn.Linear-like bounds).

    Weights stored [out_features, in_features] (torch layout); biases as
    [out_features, 1] column vectors.
    """
    keys = jax.random.split(key, 6)
    dims = [feature_size] + list(hidden_units) + [output_size]
    names = ["0", "1", "p"]
    params = {}
    ki = 0
    for n, (din, dout) in zip(names, zip(dims[:-1], dims[1:])):
        bound = 1.0 / float(din) ** 0.5
        params["w" + n] = jax.random.uniform(
            keys[ki], (dout, din), jnp.float32, -bound, bound)
        params["b" + n] = jax.random.uniform(
            keys[ki + 1], (dout, 1), jnp.float32, -bound, bound)
        ki += 2
    return params


def reference_forward(x, params):
    """Pure-JAX reference mirroring the PyTorch forward (bn off, dropout off)."""
    h = jnp.maximum(x @ params["w0"].T + params["b0"].T, 0.0)
    h = jnp.tanh(h @ params["w1"].T + params["b1"].T)
    logits = h @ params["wp"].T + params["bp"].T + 1e-10
    return jax.nn.log_softmax(logits, axis=1)


if __name__ == "__main__":
    F, O = 16, 8
    hidden_units = [32, 32]

    key = jax.random.PRNGKey(0)
    kx1, kx2, kp = jax.random.split(key, 3)
    params = init_params(kp, F, hidden_units, O)

    # 1) Small batch, default strict-f32 path, module-facing [B, O] output.
    x_small = jax.random.normal(kx1, (8, F), dtype=jnp.float32)
    out = jax.block_until_ready(feet_forward_network(x_small, params))
    ref = reference_forward(x_small, params)
    assert out.shape == (8, O)
    assert jnp.allclose(out, ref, atol=1e-5, rtol=1e-4), "f32 path mismatch"

    # 2) Ragged batch: multi-step grid + in-kernel sub-tiling + partial tail
    #    block, lane-dense class-major output (fused-consumer layout).
    x_big = jax.random.normal(kx2, (600, F), dtype=jnp.float32)
    out_cm = jax.block_until_ready(
        feet_forward_network(x_big, params, tile_b=256, sub_b=128,
                             class_major_output=True))
    ref_big = reference_forward(x_big, params)
    assert out_cm.shape == (O, 600)
    assert jnp.allclose(out_cm.T, ref_big, atol=1e-5, rtol=1e-4), \
        "tiled path mismatch"

    # 3) bf16-tanh fast path (v6e/v7x EUP mitigation) — looser tolerance.
    out_bf16 = jax.block_until_ready(
        feet_forward_network(x_small, params, tanh_in_bf16=True))
    assert jnp.allclose(out_bf16, ref, atol=5e-2, rtol=0), "bf16 path mismatch"

    print("KERNEL_OK")
</pallas_src>

<mosaic_0001>
module attributes {stable_mosaic.version = 11 : i64} {
  func.func @_mlp_logsoftmax_kernel(%arg0: i32, %arg1: memref<128x16xf32, #tpu.memory_space<vmem>>, %arg2: memref<32x16xf32, #tpu.memory_space<vmem>>, %arg3: memref<32x1xf32, #tpu.memory_space<vmem>>, %arg4: memref<32x32xf32, #tpu.memory_space<vmem>>, %arg5: memref<32x1xf32, #tpu.memory_space<vmem>>, %arg6: memref<8x32xf32, #tpu.memory_space<vmem>>, %arg7: memref<8x1xf32, #tpu.memory_space<vmem>>, %arg8: memref<8x128xf32, #tpu.memory_space<vmem>>) attributes {dimension_semantics = [#tpu.dimension_semantics<parallel>], iteration_bounds = array<i64: 1>, scalar_prefetch = 0 : i64, scratch_operands = 0 : i64, tpu.core_type = #tpu.core_type<tc>, window_params = [{transform_indices = @transform_0, window_bounds = array<i64: 128, 16>}, {pipeline_mode = #tpu.pipeline_mode<synchronous>, transform_indices = @transform_1, window_bounds = array<i64: 32, 16>}, {pipeline_mode = #tpu.pipeline_mode<synchronous>, transform_indices = @transform_2, window_bounds = array<i64: 32, 1>}, {pipeline_mode = #tpu.pipeline_mode<synchronous>, transform_indices = @transform_3, window_bounds = array<i64: 32, 32>}, {pipeline_mode = #tpu.pipeline_mode<synchronous>, transform_indices = @transform_4, window_bounds = array<i64: 32, 1>}, {pipeline_mode = #tpu.pipeline_mode<synchronous>, transform_indices = @transform_5, window_bounds = array<i64: 8, 32>}, {pipeline_mode = #tpu.pipeline_mode<synchronous>, transform_indices = @transform_6, window_bounds = array<i64: 8, 1>}, {transform_indices = @transform_7, window_bounds = array<i64: 8, 128>}]} {
    %c0 = arith.constant 0 : index
    %c0_0 = arith.constant 0 : index
    %0 = vector.load %arg2[%c0, %c0_0] : memref<32x16xf32, #tpu.memory_space<vmem>>, vector<32x16xf32>
    %c0_1 = arith.constant 0 : index
    %c0_2 = arith.constant 0 : index
    %1 = vector.load %arg3[%c0_1, %c0_2] : memref<32x1xf32, #tpu.memory_space<vmem>>, vector<32x1xf32>
    %c0_3 = arith.constant 0 : index
    %c0_4 = arith.constant 0 : index
    %2 = vector.load %arg4[%c0_3, %c0_4] : memref<32x32xf32, #tpu.memory_space<vmem>>, vector<32x32xf32>
    %c0_5 = arith.constant 0 : index
    %c0_6 = arith.constant 0 : index
    %3 = vector.load %arg5[%c0_5, %c0_6] : memref<32x1xf32, #tpu.memory_space<vmem>>, vector<32x1xf32>
    %c0_7 = arith.constant 0 : index
    %c0_8 = arith.constant 0 : index
    %4 = vector.load %arg6[%c0_7, %c0_8] : memref<8x32xf32, #tpu.memory_space<vmem>>, vector<8x32xf32>
    %c0_9 = arith.constant 0 : index
    %c0_10 = arith.constant 0 : index
    %5 = vector.load %arg7[%c0_9, %c0_10] : memref<8x1xf32, #tpu.memory_space<vmem>>, vector<8x1xf32>
    %c0_11 = arith.constant 0 : index
    %c0_12 = arith.constant 0 : index
    %6 = vector.load %arg1[%c0_11, %c0_12] : memref<128x16xf32, #tpu.memory_space<vmem>>, vector<128x16xf32>
    %cst = arith.constant dense<0.000000e+00> : vector<32x128xf32>
    %7 = tpu.matmul %0, %6, %cst {dimension_numbers = #tpu.dot_dimension_numbers<[1], [1], [0], [0], [0, 0, 1, 0], [], []>} : vector<32x16xf32>, vector<128x16xf32>, vector<32x128xf32> -> vector<32x128xf32>
    %8 = vector.broadcast %1 : vector<32x1xf32> to vector<32x128xf32>
    %9 = arith.addf %7, %8 : vector<32x128xf32>
    %cst_13 = arith.constant 0.000000e+00 : f32
    %10 = vector.broadcast %cst_13 : f32 to vector<32x128xf32>
    %11 = arith.maximumf %9, %10 : vector<32x128xf32>
    %cst_14 = arith.constant dense<0.000000e+00> : vector<32x128xf32>
    %12 = tpu.matmul %2, %11, %cst_14 {dimension_numbers = #tpu.dot_dimension_numbers<[1], [0], [0], [1], [0, 0, 1, 1], [], []>} : vector<32x32xf32>, vector<32x128xf32>, vector<32x128xf32> -> vector<32x128xf32>
    %13 = vector.broadcast %3 : vector<32x1xf32> to vector<32x128xf32>
    %14 = arith.addf %12, %13 : vector<32x128xf32>
    %15 = math.tanh %14 : vector<32x128xf32>
    %cst_15 = arith.constant dense<0.000000e+00> : vector<8x128xf32>
    %16 = tpu.matmul %4, %15, %cst_15 {dimension_numbers = #tpu.dot_dimension_numbers<[1], [0], [0], [1], [0, 0, 1, 1], [], []>} : vector<8x32xf32>, vector<32x128xf32>, vector<8x128xf32> -> vector<8x128xf32>
    %17 = vector.broadcast %5 : vector<8x1xf32> to vector<8x128xf32>
    %18 = arith.addf %16, %17 : vector<8x128xf32>
    %cst_16 = arith.constant dense<0xFF800000> : vector<128xf32>
    %19 = vector.multi_reduction <maximumf>, %18, %cst_16 [0] : vector<8x128xf32> to vector<128xf32>
    %20 = vector.shape_cast %19 : vector<128xf32> to vector<1x128xf32>
    %21 = vector.broadcast %20 : vector<1x128xf32> to vector<8x128xf32>
    %22 = arith.subf %18, %21 : vector<8x128xf32>
    %23 = math.exp %22 : vector<8x128xf32>
    %cst_17 = arith.constant dense<0.000000e+00> : vector<128xf32>
    %24 = vector.multi_reduction <add>, %23, %cst_17 [0] : vector<8x128xf32> to vector<128xf32>
    %25 = vector.shape_cast %24 : vector<128xf32> to vector<1x128xf32>
    %26 = math.log %25 : vector<1x128xf32>
    %27 = vector.broadcast %26 : vector<1x128xf32> to vector<8x128xf32>
    %28 = arith.subf %22, %27 : vector<8x128xf32>
    %c0_18 = arith.constant 0 : index
    %c0_19 = arith.constant 0 : index
    %29 = vector.load %arg8[%c0_18, %c0_19] : memref<8x128xf32, #tpu.memory_space<vmem>>, vector<8x128xf32>
    tpu.vector_store %arg8[%c0_18, %c0_19], %28 {strides = array<i32>} : memref<8x128xf32, #tpu.memory_space<vmem>>, vector<8x128xf32>,
    return
  }
  func.func @transform_0(%arg0: i32) -> (i32, i32) {
    %c0_i32 = arith.constant 0 : i32
    %c0_i32_0 = arith.constant 0 : i32
    return %arg0, %c0_i32 : i32, i32
  }
  func.func @transform_1(%arg0: i32) -> (i32, i32) {
    %c0_i32 = arith.constant 0 : i32
    %c0_i32_0 = arith.constant 0 : i32
    %c0_i32_1 = arith.constant 0 : i32
    return %c0_i32, %c0_i32_0 : i32, i32
  }
  func.func @transform_2(%arg0: i32) -> (i32, i32) {
    %c0_i32 = arith.constant 0 : i32
    %c0_i32_0 = arith.constant 0 : i32
    %c0_i32_1 = arith.constant 0 : i32
    return %c0_i32, %c0_i32_0 : i32, i32
  }
  func.func @transform_3(%arg0: i32) -> (i32, i32) {
    %c0_i32 = arith.constant 0 : i32
    %c0_i32_0 = arith.constant 0 : i32
    %c0_i32_1 = arith.constant 0 : i32
    return %c0_i32, %c0_i32_0 : i32, i32
  }
  func.func @transform_4(%arg0: i32) -> (i32, i32) {
    %c0_i32 = arith.constant 0 : i32
    %c0_i32_0 = arith.constant 0 : i32
    %c0_i32_1 = arith.constant 0 : i32
    return %c0_i32, %c0_i32_0 : i32, i32
  }
  func.func @transform_5(%arg0: i32) -> (i32, i32) {
    %c0_i32 = arith.constant 0 : i32
    %c0_i32_0 = arith.constant 0 : i32
    %c0_i32_1 = arith.constant 0 : i32
    return %c0_i32, %c0_i32_0 : i32, i32
  }
  func.func @transform_6(%arg0: i32) -> (i32, i32) {
    %c0_i32 = arith.constant 0 : i32
    %c0_i32_0 = arith.constant 0 : i32
    %c0_i32_1 = arith.constant 0 : i32
    return %c0_i32, %c0_i32_0 : i32, i32
  }
  func.func @transform_7(%arg0: i32) -> (i32, i32) {
    %c0_i32 = arith.constant 0 : i32
    %c0_i32_0 = arith.constant 0 : i32
    return %c0_i32, %arg0 : i32, i32
  }
}

</mosaic_0001>

<bundles_post_ra>
// kernel: tpu_custom_call.1
= control target key start
LH: loop header
LB: loop body
LE: loop exit
PB: predicated region body
PF: predicated region fallthrough
CT: control target
= control target key end

     0   :  { %vm81_vm0 = vcmask 130048   ;;  %v625_v2 = vmov 0   ;;  %s815_s0 = inlined_call_operand.vmem [shape: f32[8,16], index: 0, kind: input, shape index: {}]   ;;  %s816_s1 = inlined_call_operand.vmem [shape: f32[32,16], index: 1, kind: input, shape index: {}]   ;;  %s817_s2 = inlined_call_operand.vmem [shape: f32[32,1], index: 2, kind: input, shape index: {}]   ;;  %s818_s3 = inlined_call_operand.vmem [shape: f32[32,32], index: 3, kind: input, shape index: {}]   ;;  %s819_s4 = inlined_call_operand.vmem [shape: f32[32,1], index: 4, kind: input, shape index: {}]   ;;  %s820_s5 = inlined_call_operand.vmem [shape: f32[8,32], index: 5, kind: input, shape index: {}]   ;;  %s821_s6 = inlined_call_operand.vmem [shape: f32[8,1], index: 6, kind: input, shape index: {}]   ;;  %s822_s7 = inlined_call_operand.hbm [shape: f32[8,8], index: 7, kind: output, shape index: {}]  }
   0x1   :  { %v60_v0 = vld [vmem:[%s815_s0 + $0x78] sm:$0xff]  ;;  %v59_v1 = vld [vmem:[%s815_s0 + $0x70] sm:$0xff]  ;;  %589 = vset.pattern.permute.xlu0 %v625_v2  ;;  %590 = vset.pattern.permute.xlu1 %v625_v2  ;;  %v58_v3 = vld [vmem:[%s815_s0 + $0x68] sm:$0xff] }
   0x2   :  { %522 = vmatprep.subr.msk.mxu0 %vm81_vm0, %v60_v0  ;;  %v27_v4 = vld [vmem:[%s816_s1] sm:$0xff]  ;;  %v34_v5 = vld [vmem:[%s817_s2 + $0x18] sm:$0xff]  ;;  %v32_v6 = vld [vmem:[%s817_s2 + $0x8] sm:$0xff] }
   0x3   :  { %523 = vmatpush3.xpose.msk.msra.mxu0 %vm81_vm0, %v60_v0  ;;  %554 = vmatprep.mubr.msk.f32.mxu0 %vm81_vm0, %v27_v4  ;;  %v57_v7 = vld [vmem:[%s815_s0 + $0x60] sm:$0xff]  ;;  %v33_v8 = vld [vmem:[%s817_s2 + $0x10] sm:$0xff] }
   0x4   :  { %524 = vmatprep.subr.msk.mxu0 %vm81_vm0, %v59_v1  ;;  %78 = vperm.xlu0 %589, %v34_v5   ;;  %v31_v9 = vld [vmem:[%s817_s2] sm:$0xff] }
   0x5   :  { %68 = vperm.xlu1 %590, %v32_v6  }
   0x7   :  { %525 = vmatpush3.xpose.msk.msra.mxu0 %vm81_vm0, %v59_v1 }
   0x8   :  { %526 = vmatprep.subr.msk.mxu0 %vm81_vm0, %v58_v3 }
   0x9   :  { %12 = vsyncpa [#allocation3], 0  ;;  %73 = vperm.xlu0 %589, %v33_v8   ;;  %v56_v10 = vld [vmem:[%s815_s0 + $0x58] sm:$0xff]  ;;  %63 = vperm.xlu1 %590, %v31_v9   ;;  %v41_v12 = vld [vmem:[%s819_s4 + $0x10] sm:$0xff]  ;;  %vm251_vm1 = vcmask 261120   ;;  %v626_v50 = vmov 0.0  }
   0xa   :  { %v42_v11 = vld [vmem:[%s819_s4 + $0x18] sm:$0xff]  ;;  %v55_v13 = vld [vmem:[%s815_s0 + $0x50] sm:$0xff]  ;;  %v40_v14 = vld [vmem:[%s819_s4 + $0x8] sm:$0xff]  ;;  %vm627_vm2 = vmmov 0  }
   0xb   :  { %527 = vmatpush3.xpose.msk.msra.mxu0 %vm81_vm0, %v58_v3  ;;  %v39_v15 = vld [vmem:[%s819_s4] sm:$0xff]  ;;  %v54_v16 = vld [vmem:[%s815_s0 + $0x48] sm:$0xff]  ;;  %v52_v19 = vld [vmem:[%s815_s0 + $0x38] sm:$0xff] }
   0xc   :  { %528 = vmatprep.subr.msk.mxu0 %vm81_vm0, %v57_v7  ;;  %v44_v17 = vld [vmem:[%s821_s6] sm:$0xff]  ;;  %v51_v20 = vld [vmem:[%s815_s0 + $0x30] sm:$0xff]  ;;  %v50_v21 = vld [vmem:[%s815_s0 + $0x28] sm:$0xff] }
   0xd   :  { %248 = vperm.xlu0 %589, %v42_v11   ;;  %243 = vperm.xlu1 %590, %v41_v12   ;;  %v53_v18 = vld [vmem:[%s815_s0 + $0x40] sm:$0xff]  ;;  %v48_v23 = vld [vmem:[%s815_s0 + $0x18] sm:$0xff]  ;;  %v47_v24 = vld [vmem:[%s815_s0 + $0x10] sm:$0xff] }
   0xe   :  { %v49_v22 = vld [vmem:[%s815_s0 + $0x20] sm:$0xff]  ;;  %v46_v25 = vld [vmem:[%s815_s0 + $0x8] sm:$0xff]  ;;  %v29_v28 = vld [vmem:[%s816_s1 + $0x10] sm:$0xff] }
   0xf   :  { %529 = vmatpush3.xpose.msk.msra.mxu0 %vm81_vm0, %v57_v7  ;;  %v45_v26 = vld [vmem:[%s815_s0] sm:$0xff]  ;;  %v28_v27 = vld [vmem:[%s816_s1 + $0x8] sm:$0xff]  ;;  %v30_v29 = vld [vmem:[%s816_s1 + $0x18] sm:$0xff] }
  0x10   :  { %530 = vmatprep.subr.msk.mxu0 %vm81_vm0, %v56_v10  ;;  %v35_v30 = vld [vmem:[%s818_s3] sm:$0xff]  ;;  %v36_v47 = vld [vmem:[%s818_s3 + $0x8] sm:$0xff]  ;;  %v37_v48 = vld [vmem:[%s818_s3 + $0x10] sm:$0xff] }
  0x11   :  { %238 = vperm.xlu0 %589, %v40_v14   ;;  %233 = vperm.xlu1 %590, %v39_v15   ;;  %v38_v49 = vld [vmem:[%s818_s3 + $0x18] sm:$0xff]  ;;  %v43_v2 = vld [vmem:[%s820_s5] sm:$0xff]  ;;  %s628_s5 = smov [#allocation2]  }
  0x12   :  { %568 = vmatprep.mubr.msk.f32.mxu1 %vm251_vm1, %v35_v30  ;;  %s456_s14 = sshll.u32 %s628_s5, 4  ;;  %s457_s14 = int_to_ptr.vmem [resolvable:$true] %s456_s14 }
  0x13   :  { %531 = vmatpush3.xpose.msk.msra.mxu0 %vm81_vm0, %v56_v10  ;;  %s603_s15 = scalar_lea.vmem %s457_s14, 128  ;;  %p608_p1 = scmp.lt.s32.totalorder %s457_s14, %s457_s14 }
  0x14   :  { %532 = vmatprep.subr.msk.mxu0 %vm81_vm0, %v55_v13  ;;  %p604_p0 = scmp.ne.s32.totalorder %s457_s14, %s603_s15  ;;  %p609_p2 = scmp.lt.s32.totalorder %s603_s15, %s603_s15 }
  0x15   :  { %355 = vperm.xlu0 %589, %v44_v17  }
  0x16   :  { %p610_p3 = por %p609_p2, %p608_p1 }
  0x17   :  { %533 = vmatpush3.xpose.msk.msra.mxu0 %vm81_vm0, %v55_v13 }
  0x18   :  { %534 = vmatprep.subr.msk.mxu0 %vm81_vm0, %v54_v16  ;;  %p611_p4 = pnand %p610_p3, %p604_p0 }
  0x1b   :  { %535 = vmatpush3.xpose.msk.msra.mxu0 %vm81_vm0, %v54_v16 }
  0x1c   :  { %536 = vmatprep.subr.msk.mxu0 %vm81_vm0, %v53_v18 }
  0x1f   :  { %537 = vmatpush3.xpose.msk.msra.mxu0 %vm81_vm0, %v53_v18 }
  0x20   :  { %538 = vmatprep.subr.msk.mxu0 %vm81_vm0, %v52_v19 }
  0x23   :  { %539 = vmatpush3.xpose.msk.msra.mxu0 %vm81_vm0, %v52_v19 }
  0x24   :  { %540 = vmatprep.subr.msk.mxu0 %vm81_vm0, %v51_v20 }
  0x27   :  { %541 = vmatpush3.xpose.msk.msra.mxu0 %vm81_vm0, %v51_v20 }
  0x28   :  { %542 = vmatprep.subr.msk.mxu0 %vm81_vm0, %v50_v21 }
  0x2b   :  { %543 = vmatpush3.xpose.msk.msra.mxu0 %vm81_vm0, %v50_v21 }
  0x2c   :  { %544 = vmatprep.subr.msk.mxu0 %vm81_vm0, %v49_v22 }
  0x2f   :  { %545 = vmatpush3.xpose.msk.msra.mxu0 %vm81_vm0, %v49_v22 }
  0x30   :  { %546 = vmatprep.subr.msk.mxu0 %vm81_vm0, %v48_v23 }
  0x33   :  { %547 = vmatpush3.xpose.msk.msra.mxu0 %vm81_vm0, %v48_v23 }
  0x34   :  { %548 = vmatprep.subr.msk.mxu0 %vm81_vm0, %v47_v24 }
  0x37   :  { %549 = vmatpush3.xpose.msk.msra.mxu0 %vm81_vm0, %v47_v24 }
  0x38   :  { %550 = vmatprep.subr.msk.mxu0 %vm81_vm0, %v46_v25 }
  0x3b   :  { %551 = vmatpush3.xpose.msk.msra.mxu0 %vm81_vm0, %v46_v25 }
  0x3c   :  { %552 = vmatprep.subr.msk.mxu0 %vm81_vm0, %v45_v26 }
  0x3f   :  { %553 = vmatpush3.xpose.msk.msra.mxu0 %vm81_vm0, %v45_v26 }
  0x42   :  { %555 = vmatmul.mubr.msk.f32.vlgmr.msra.gmra.mxu0 %vm81_vm0, %v28_v27 }
  0x43   :  { %557 = vmatprep.mubr.msk.f32.mxu0 %vm81_vm0, %v29_v28 }
  0x46   :  { %558 = vmatmul.mubr.msk.f32.gmra.mxu0 %vm81_vm0, %v30_v29 }
  0x7f   :  { %v79_v31 = vpop.permute.xlu0 %78 }
  0x80   :  { %v69_v33 = vpop.permute.xlu1 %68 }
  0x84   :  { %v74_v37 = vpop.permute.xlu0 %73  ;;  %v64_v42 = vpop.permute.xlu1 %63 }
  0x88   :  { %v249_v51 = vpop.permute.xlu0 %248  ;;  %v244_v53 = vpop.permute.xlu1 %243 }
  0x8c   :  { %v239_v57 = vpop.permute.xlu0 %238  ;;  %v234_v61 = vpop.permute.xlu1 %233 }
  0x90   :  { %v356_v4 = vpop.permute.xlu0 %355 }
 0x102   :  { %v556_v32 = vpop.f32.mrf.mxu0 }
 0x103   :  { %v214_v39 = vadd.f32 %v556_v32, %v69_v33 }
 0x104   :  { %v208_v34 = vpop.f32.mrf.mxu0 }
 0x105   :  { %v209_v43 = vadd.f32 %v208_v34, %v64_v42  ;;  %v228_v45 = vmax.f32 %v214_v39, 0.0 }
 0x106   :  { %v559_v35 = vpop.f32.mrf.mxu0 }
 0x107   :  { %v224_v36 = vadd.f32 %v559_v35, %v79_v31  ;;  %v227_v46 = vmax.f32 %v209_v43, 0.0 }
 0x108   :  { %v218_v38 = vpop.f32.mrf.mxu0 }
 0x109   :  { %v230_v40 = vmax.f32 %v224_v36, 0.0  ;;  %v219_v41 = vadd.f32 %v218_v38, %v74_v37 }
 0x10b   :  { %v229_v44 = vmax.f32 %v219_v41, 0.0  ;;  %560 = vmatprep.subr.mxu1 %v230_v40 }
 0x10c   :  { %561 = vmatpush3.msra.mxu1 %v230_v40 }
 0x10d   :  { %562 = vmatprep.subr.mxu1 %v229_v44 }
 0x10e   :  { %563 = vmatpush3.msra.mxu1 %v229_v44 }
 0x10f   :  { %564 = vmatprep.subr.mxu1 %v228_v45 }
 0x110   :  { %565 = vmatpush3.msra.mxu1 %v228_v45 }
 0x111   :  { %566 = vmatprep.subr.mxu1 %v227_v46 }
 0x112   :  { %567 = vmatpush3.msra.mxu1 %v227_v46 }
 0x113   :  { %569 = vmatmul.mubr.msk.f32.vlgmr.msra.gmra.mxu1 %vm251_vm1, %v36_v47  ;;  %574 = vmatprep.subr.mxu1 %v626_v50 }
 0x114   :  { %571 = vmatprep.mubr.msk.f32.mxu1 %vm251_vm1, %v37_v48 }
 0x117   :  { %572 = vmatmul.mubr.msk.f32.gmra.mxu1 %vm251_vm1, %v38_v49 }
 0x118   :  { %582 = vmatprep.mubr.msk.f32.mxu1 %vm627_vm2, %v626_v50 }
 0x1d3   :  { %v570_v52 = vpop.f32.mrf.mxu1 }
 0x1d4   :  { %v336_v59 = vadd.f32 %v570_v52, %v239_v57 }
 0x1d5   :  { %v330_v54 = vpop.f32.mrf.mxu1 }
 0x1d6   :  { %v331_v62 = vadd.f32 %v330_v54, %v234_v61 }
 0x1d7   :  { %v573_v55 = vpop.f32.mrf.mxu1 }
 0x1d8   :  { %v346_v56 = vadd.f32 %v573_v55, %v249_v51 }
 0x1d9   :  { %v340_v58 = vpop.f32.mrf.mxu1 }
 0x1da   :  { %591 = vtanh.f32 %v346_v56  ;;  %v341_v60 = vadd.f32 %v340_v58, %v244_v53 }
 0x1dc   :  { %593 = vtanh.f32 %v341_v60 }
 0x1dd   :  { %595 = vtanh.f32 %v336_v59 }
 0x1de   :  { %597 = vtanh.f32 %v331_v62 }
 0x1e7   :  { %v592_v63 = vpop.eup %591 }
 0x1e8   :  { %575 = vmatpush3.msra.mxu1 %v592_v63 }
 0x1e9   :  { %v594_v0 = vpop.eup %593  ;;  %576 = vmatprep.subr.mxu1 %v626_v50 }
 0x1ea   :  { %577 = vmatpush3.msra.mxu1 %v594_v0  ;;  %v596_v1 = vpop.eup %595 }
 0x1eb   :  { %578 = vmatprep.subr.mxu1 %v626_v50  ;;  %v598_v3 = vpop.eup %597 }
 0x1ec   :  { %579 = vmatpush3.msra.mxu1 %v596_v1 }
 0x1ed   :  { %580 = vmatprep.subr.mxu1 %v626_v50 }
 0x1ee   :  { %581 = vmatpush3.msra.mxu1 %v598_v3 }
 0x1ef   :  { %583 = vmatmul.mubr.msk.f32.vlgmr.msra.gmra.mxu1 %vm251_vm1, %v43_v2 }
 0x2af   :  { %v427_v5 = vpop.f32.mrf.mxu1 }
 0x2b0   :  { %v428_v6 = vadd.f32 %v427_v5, %v356_v4 }
 0x2b1   :  { %v584_v7 = vpop.f32.mrf.mxu1 }
 0x2b2   :  { %v431_v8 = vrot.slane %v428_v6, 4 }
 0x2b4   :  { %v432_v9 = vmax.f32 %v428_v6, %v431_v8 }
 0x2b6   :  { %v433_v10 = vrot.slane %v432_v9, 2 }
 0x2b8   :  { %v434_v11 = vmax.f32 %v432_v9, %v433_v10 }
 0x2ba   :  { %v435_v12 = vrot.slane %v434_v11, 1 }
 0x2bc   :  { %v436_v13 = vmax.f32 %v434_v11, %v435_v12 }
 0x2be   :  { %v437_v14 = vsub.f32 %v428_v6, %v436_v13 }
 0x2c0   :  { %v438_v15 = vmul.f32 1.442695, %v437_v14 }
 0x2c2   :  { %599 = vpow2.f32 %v438_v15 }
 0x2cf   :  { %v600_v16 = vpop.eup %599 }
 0x2d0   :  { %v440_v17 = vrot.slane %v600_v16, 4 }
 0x2d2   :  { %v441_v18 = vadd.f32 %v600_v16, %v440_v17 }
 0x2d4   :  { %v442_v19 = vrot.slane %v441_v18, 2 }
 0x2d6   :  { %v443_v20 = vadd.f32 %v442_v19, %v441_v18 }
 0x2d8   :  { %v444_v21 = vrot.slane %v443_v20, 1 }
 0x2da   :  { %v445_v22 = vadd.f32 %v444_v21, %v443_v20 }
 0x2dc   :  { %601 = vlog2.f32 %v445_v22 }
 0x2e9   :  { %v602_v23 = vpop.eup %601 }
 0x2ea   :  { %v447_v24 = vmul.f32 0.6931472, %v602_v23 }
 0x2ec   :  { %v448_v25 = vsub.f32 %v437_v14, %v447_v24 }
 0x2ee   :  { %449 = vst [vmem:[#allocation2] sm:$0xff] %v448_v25 }
 0x2ef   :  { %614 = shalt.err (!%p611_p4)
}
 0x2f0   :  { %459 = dma.vmem_to_hbm [thread:$0]  %s457_s14, 128, %s822_s7, [#allocation3]  }
 0x2f1   :  { %623 = dma.done.wait [#allocation3], 128  }
 0x2f2   :  { %624 = vsyncadd [#allocation3], 4294967168 }
 0x2f3   :  { %463 = vsyncpa [#allocation3], 1 }

</bundles_post_ra>
